<compile_context>
chip_gen: v7x
topology: tpu7x:2x2x1
jax: 0.10.0
libtpu: 0.0.40
codegen_flags: <defaults>
</compile_context>

<pallas_src>
import math

import jax
import jax.numpy as jnp
from jax.experimental import pallas as pl
from jax.experimental.pallas import tpu as pltpu


def _round_up(x, m):
    return ((x + m - 1) // m) * m


def _pos_embed_gen_kernel(x_ref, wt_ref, aux_ref, o_ref):
    # Fast path: pe(+bias) generated on the fly -- no pe HBM stream.
    #   x_ref:   (tm, T)   input rows for this tile (streamed, double-buffered)
    #   wt_ref:  (T, Dp)   pre-transposed embed weight (constant block, VMEM-resident)
    #   aux_ref: (3, Dp)   rows = [freq, phase, bias]; pe[s,d] = sin(s*freq[d] + phase[d])
    #   o_ref:   (tm, Dp)  output tile
    tm, dp = o_ref.shape
    y = jnp.dot(x_ref[...], wt_ref[...], preferred_element_type=jnp.float32)

    freq = aux_ref[0:1, :].astype(jnp.float32)    # (1, Dp)
    phase = aux_ref[1:2, :].astype(jnp.float32)   # (1, Dp)
    bias = aux_ref[2:3, :].astype(jnp.float32)    # (1, Dp)

    row0 = pl.program_id(0) * tm                  # global row offset of this tile
    pos = (jax.lax.broadcasted_iota(jnp.int32, (tm, dp), 0) + row0).astype(jnp.float32)
    # sin(x + pi/2) == cos(x): one EUP transcendental per element (EUP slot has slack
    # under the mem-bound DMA on v6e/v7x).
    pe = jnp.sin(pos * freq + phase)
    o_ref[...] = (y + pe + bias).astype(o_ref.dtype)


def _pos_embed_stream_kernel(x_ref, wt_ref, peb_ref, o_ref):
    # Fallback path: (pe + bias) rows streamed from HBM (previous design).
    y = jnp.dot(x_ref[...], wt_ref[...], preferred_element_type=jnp.float32)
    o_ref[...] = (y + peb_ref[...].astype(jnp.float32)).astype(o_ref.dtype)


def init_positional_embedding_params(weight, bias, dtype=jnp.float32):
    """One-time parameter prep (outside the per-call hot path).

    weight: (D, T) torch nn.Linear layout; bias: (D,). d_model D must be even (as in torch).
    The feature dim is zero-padded to a multiple of 128 so kernel stores are lane-dense;
    padded columns are sliced off after the call.

    dtype=jnp.bfloat16 is the documented fast path (halves the weight / peb / output
    streams); the tiny resident aux table stays f32 to keep the sin arguments exact.
    """
    weight = jnp.asarray(weight)
    bias = jnp.asarray(bias)
    D, T = weight.shape
    assert D % 2 == 0, "d_model must be even (torch pe construction requires it)"
    Dp = max(_round_up(D, 128), 128)

    # Pre-transposed weight, padded to lane-dense width.
    wt = jnp.zeros((T, Dp), dtype).at[:, :D].set(weight.T.astype(dtype))

    # pe[s, d] = sin(s * div_term[d//2]) for even d, cos(...) for odd d
    #          = sin(s * freq[d] + phase[d]) with phase = 0 (even) / pi/2 (odd).
    div_term = jnp.exp(jnp.arange(0, D, 2, dtype=jnp.float32) * (-math.log(10000.0) / D))
    freq = jnp.repeat(div_term, 2)                                     # (D,)
    phase = jnp.tile(jnp.array([0.0, math.pi / 2.0], jnp.float32), D // 2)
    aux = jnp.zeros((3, Dp), jnp.float32)
    aux = aux.at[0, :D].set(freq).at[1, :D].set(phase)
    aux = aux.at[2, :D].set(bias.astype(jnp.float32))

    # Materialized pe + bias table: only used by the streaming fallback path.
    pos = jnp.arange(D, dtype=jnp.float32)[:, None]                    # (D, 1)
    pe = jnp.zeros((D, D), jnp.float32)
    pe = pe.at[:, 0::2].set(jnp.sin(pos * div_term))
    pe = pe.at[:, 1::2].set(jnp.cos(pos * div_term))
    peb = jnp.zeros((D, Dp), dtype).at[:, :D].set((pe + bias[None, :]).astype(dtype))

    return {"wt": wt, "aux": aux, "peb": peb, "d_model": D}


def positional_embedding_forward(x, params, *, out_dtype=None, generate_pe=True,
                                 block_m=None):
    """x: (S, T).  Returns (S, d_model) = embed(x) + pe[:S, :]  (eval-mode dropout).

    generate_pe=True : pe(+bias) computed in-kernel (no pe HBM stream) -- fast path.
    generate_pe=False: streams the precomputed (pe + bias) rows -- fallback path.
    """
    wt, aux, peb, D = params["wt"], params["aux"], params["peb"], params["d_model"]
    S, T = x.shape
    T2, Dp = wt.shape
    assert T == T2, "weight / input feature mismatch"
    assert S <= D, "pe slice pe[:, :S, :] requires seq_len <= d_model"
    out_dtype = out_dtype if out_dtype is not None else x.dtype

    itemsize = 4  # budget conservatively for f32 streams

    # Device-aware VMEM budget: ~25% headroom (=> ~48 MiB cap on v7x's 64 MiB VMEM).
    try:
        vmem_phys = pltpu.get_tpu_info().vmem_capacity_bytes
    except Exception:
        vmem_phys = 64 * 1024 * 1024  # conservative fallback
    vmem_budget = int(vmem_phys * 0.75)

    # Resident (constant-index) blocks: weight + aux/peb table (both double-buffered
    # by the default pipeliner; aux pads to 8 sublanes).
    resident = 2 * (T * Dp + 8 * Dp) * itemsize
    # Streamed bytes per output row (double-buffered): x in + out (+ peb in fallback mode).
    per_row = 2 * (T + Dp + (0 if generate_pe else Dp)) * itemsize

    if block_m is None:
        tm = (vmem_budget - resident) // max(per_row, 1)
        tm = max(8, min((int(tm) // 8) * 8, 1024))   # largest multiple-of-8 tile in budget
    else:
        tm = block_m
    if S <= tm:
        # Split short sequences into >= 2 tiles when possible: both v7x TensorCores get
        # work and the BlockSpec pipeline has more than one stage to overlap.
        tm = _round_up(pl.cdiv(S, 2), 8) if S > 16 else S
    grid_m = pl.cdiv(S, tm)

    # Tight scoped-VMEM request: actual estimate + small headroom, clamped to the device.
    vmem_limit = int(min(vmem_budget, resident + per_row * tm + 4 * 1024 * 1024))

    common = dict(
        out_shape=jax.ShapeDtypeStruct((S, Dp), out_dtype),
        grid=(grid_m,),
        out_specs=pl.BlockSpec((tm, Dp), lambda i: (i, 0)),
        compiler_params=pltpu.CompilerParams(
            dimension_semantics=("parallel",),   # no cross-tile carry -> megacore-shardable
            vmem_limit_bytes=vmem_limit,
        ),
    )

    if generate_pe:
        out = pl.pallas_call(
            _pos_embed_gen_kernel,
            in_specs=[
                pl.BlockSpec((tm, T), lambda i: (i, 0)),    # x rows: streamed
                pl.BlockSpec((T, Dp), lambda i: (0, 0)),    # weight: resident constant block
                pl.BlockSpec((3, Dp), lambda i: (0, 0)),    # freq/phase/bias: tiny resident
            ],
            **common,
        )(x, wt, aux)
    else:
        out = pl.pallas_call(
            _pos_embed_stream_kernel,
            in_specs=[
                pl.BlockSpec((tm, T), lambda i: (i, 0)),    # x rows: streamed
                pl.BlockSpec((T, Dp), lambda i: (0, 0)),    # weight: resident constant block
                pl.BlockSpec((tm, Dp), lambda i: (i, 0)),   # pe+bias rows: streamed
            ],
            **common,
        )(x, wt, peb)

    return out if Dp == D else out[:, :D]


if __name__ == "__main__":
    # Small shapes consistent with the module's forward.
    neural_tsteps = 16   # T  (Linear in_features)
    d_model = 32         # D  (Linear out_features; pe buffer is D x D) -- must be even
    seq_len = 8          # S  (x.size(0); must be <= d_model)

    key = jax.random.PRNGKey(0)
    kx, kw, kb = jax.random.split(key, 3)

    # Deterministic synthetic parameters (torch-Linear-like shapes / init bounds).
    bound = 1.0 / math.sqrt(neural_tsteps)
    weight = jax.random.uniform(kw, (d_model, neural_tsteps),
                                minval=-bound, maxval=bound, dtype=jnp.float32)
    bias = jax.random.uniform(kb, (d_model,),
                              minval=-bound, maxval=bound, dtype=jnp.float32)
    x = jax.random.normal(kx, (seq_len, neural_tsteps), dtype=jnp.float32)

    # One-time param prep, then the tiled kernel call (in-kernel pe generation).
    params = init_positional_embedding_params(weight, bias)
    try:
        out = positional_embedding_forward(x, params, generate_pe=True)
    except Exception:
        # Robustness fallback for toolchains lacking in-kernel sin lowering.
        out = positional_embedding_forward(x, params, generate_pe=False)
    out = jax.block_until_ready(out)

    # Reference in plain JAX: pe built exactly like the PyTorch buffer; eval dropout == id.
    pos = jnp.arange(d_model, dtype=jnp.float32)[:, None]
    div_term = jnp.exp(jnp.arange(0, d_model, 2, dtype=jnp.float32)
                       * (-math.log(10000.0) / d_model))
    pe = jnp.zeros((d_model, d_model), jnp.float32)
    pe = pe.at[:, 0::2].set(jnp.sin(pos * div_term))
    pe = pe.at[:, 1::2].set(jnp.cos(pos * div_term))
    ref = x @ weight.T + bias + pe[:seq_len, :]

    assert out.shape == (seq_len, d_model)
    assert jnp.allclose(out, ref, atol=1e-4, rtol=1e-4), float(jnp.max(jnp.abs(out - ref)))

    print("KERNEL_OK")
</pallas_src>

<mosaic_0001>
module attributes {stable_mosaic.version = 11 : i64} {
  func.func @_pos_embed_gen_kernel(%arg0: i32, %arg1: memref<8x16xf32, #tpu.memory_space<vmem>>, %arg2: memref<16x128xf32, #tpu.memory_space<vmem>>, %arg3: memref<3x128xf32, #tpu.memory_space<vmem>>, %arg4: memref<8x128xf32, #tpu.memory_space<vmem>>) attributes {dimension_semantics = [#tpu.dimension_semantics<parallel>], iteration_bounds = array<i64: 1>, scalar_prefetch = 0 : i64, scratch_operands = 0 : i64, tpu.core_type = #tpu.core_type<tc>, window_params = [{transform_indices = @transform_0, window_bounds = array<i64: 8, 16>}, {pipeline_mode = #tpu.pipeline_mode<synchronous>, transform_indices = @transform_1, window_bounds = array<i64: 16, 128>}, {pipeline_mode = #tpu.pipeline_mode<synchronous>, transform_indices = @transform_2, window_bounds = array<i64: 3, 128>}, {transform_indices = @transform_3, window_bounds = array<i64: 8, 128>}]} {
    %c0 = arith.constant 0 : index
    %c0_0 = arith.constant 0 : index
    %0 = vector.load %arg1[%c0, %c0_0] : memref<8x16xf32, #tpu.memory_space<vmem>>, vector<8x16xf32>
    %c0_1 = arith.constant 0 : index
    %c0_2 = arith.constant 0 : index
    %1 = vector.load %arg2[%c0_1, %c0_2] : memref<16x128xf32, #tpu.memory_space<vmem>>, vector<16x128xf32>
    %cst = arith.constant dense<0.000000e+00> : vector<8x128xf32>
    %2 = tpu.matmul %0, %1, %cst {dimension_numbers = #tpu.dot_dimension_numbers<[1], [0], [0], [1], [0, 0, 1, 1], [], []>} : vector<8x16xf32>, vector<16x128xf32>, vector<8x128xf32> -> vector<8x128xf32>
    %c0_3 = arith.constant 0 : index
    %c0_4 = arith.constant 0 : index
    %3 = vector.load %arg3[%c0_3, %c0_4] : memref<3x128xf32, #tpu.memory_space<vmem>>, vector<1x128xf32>
    %c1 = arith.constant 1 : index
    %c0_5 = arith.constant 0 : index
    %4 = vector.load %arg3[%c1, %c0_5] : memref<3x128xf32, #tpu.memory_space<vmem>>, vector<1x128xf32>
    %c2 = arith.constant 2 : index
    %c0_6 = arith.constant 0 : index
    %5 = vector.load %arg3[%c2, %c0_6] : memref<3x128xf32, #tpu.memory_space<vmem>>, vector<1x128xf32>
    %c8_i32 = arith.constant 8 : i32
    %6 = arith.muli %arg0, %c8_i32 : i32
    %7 = tpu.iota {dimensions = array<i32: 0>} : vector<8x128xi32>
    %8 = vector.broadcast %6 : i32 to vector<8x128xi32>
    %9 = arith.addi %7, %8 : vector<8x128xi32>
    %10 = arith.sitofp %9 : vector<8x128xi32> to vector<8x128xf32>
    %11 = vector.broadcast %3 : vector<1x128xf32> to vector<8x128xf32>
    %12 = arith.mulf %10, %11 : vector<8x128xf32>
    %13 = vector.broadcast %4 : vector<1x128xf32> to vector<8x128xf32>
    %14 = arith.addf %12, %13 : vector<8x128xf32>
    %15 = math.sin %14 : vector<8x128xf32>
    %16 = arith.addf %2, %15 : vector<8x128xf32>
    %17 = vector.broadcast %5 : vector<1x128xf32> to vector<8x128xf32>
    %18 = arith.addf %16, %17 : vector<8x128xf32>
    %c0_7 = arith.constant 0 : index
    %c0_8 = arith.constant 0 : index
    %19 = vector.load %arg4[%c0_7, %c0_8] : memref<8x128xf32, #tpu.memory_space<vmem>>, vector<8x128xf32>
    tpu.vector_store %arg4[%c0_7, %c0_8], %18 {strides = array<i32>} : memref<8x128xf32, #tpu.memory_space<vmem>>, vector<8x128xf32>,
    return
  }
  func.func @transform_0(%arg0: i32) -> (i32, i32) {
    %c0_i32 = arith.constant 0 : i32
    %c0_i32_0 = arith.constant 0 : i32
    return %arg0, %c0_i32 : i32, i32
  }
  func.func @transform_1(%arg0: i32) -> (i32, i32) {
    %c0_i32 = arith.constant 0 : i32
    %c0_i32_0 = arith.constant 0 : i32
    %c0_i32_1 = arith.constant 0 : i32
    return %c0_i32, %c0_i32_0 : i32, i32
  }
  func.func @transform_2(%arg0: i32) -> (i32, i32) {
    %c0_i32 = arith.constant 0 : i32
    %c0_i32_0 = arith.constant 0 : i32
    %c0_i32_1 = arith.constant 0 : i32
    return %c0_i32, %c0_i32_0 : i32, i32
  }
  func.func @transform_3(%arg0: i32) -> (i32, i32) {
    %c0_i32 = arith.constant 0 : i32
    %c0_i32_0 = arith.constant 0 : i32
    return %arg0, %c0_i32 : i32, i32
  }
}

module attributes {stable_mosaic.version = 11 : i64} {
  func.func @_pos_embed_stream_kernel(%arg0: i32, %arg1: memref<8x16xf32, #tpu.memory_space<vmem>>, %arg2: memref<16x128xf32, #tpu.memory_space<vmem>>, %arg3: memref<8x128xf32, #tpu.memory_space<vmem>>, %arg4: memref<8x128xf32, #tpu.memory_space<vmem>>) attributes {dimension_semantics = [#tpu.dimension_semantics<parallel>], iteration_bounds = array<i64: 1>, scalar_prefetch = 0 : i64, scratch_operands = 0 : i64, tpu.core_type = #tpu.core_type<tc>, window_params = [{transform_indices = @transform_0, window_bounds = array<i64: 8, 16>}, {pipeline_mode = #tpu.pipeline_mode<synchronous>, transform_indices = @transform_1, window_bounds = array<i64: 16, 128>}, {transform_indices = @transform_2, window_bounds = array<i64: 8, 128>}, {transform_indices = @transform_3, window_bounds = array<i64: 8, 128>}]} {
    %c0 = arith.constant 0 : index
    %c0_0 = arith.constant 0 : index
    %0 = vector.load %arg1[%c0, %c0_0] : memref<8x16xf32, #tpu.memory_space<vmem>>, vector<8x16xf32>
    %c0_1 = arith.constant 0 : index
    %c0_2 = arith.constant 0 : index
    %1 = vector.load %arg2[%c0_1, %c0_2] : memref<16x128xf32, #tpu.memory_space<vmem>>, vector<16x128xf32>
    %cst = arith.constant dense<0.000000e+00> : vector<8x128xf32>
    %2 = tpu.matmul %0, %1, %cst {dimension_numbers = #tpu.dot_dimension_numbers<[1], [0], [0], [1], [0, 0, 1, 1], [], []>} : vector<8x16xf32>, vector<16x128xf32>, vector<8x128xf32> -> vector<8x128xf32>
    %c0_3 = arith.constant 0 : index
    %c0_4 = arith.constant 0 : index
    %3 = vector.load %arg3[%c0_3, %c0_4] : memref<8x128xf32, #tpu.memory_space<vmem>>, vector<8x128xf32>
    %4 = arith.addf %2, %3 : vector<8x128xf32>
    %c0_5 = arith.constant 0 : index
    %c0_6 = arith.constant 0 : index
    %5 = vector.load %arg4[%c0_5, %c0_6] : memref<8x128xf32, #tpu.memory_space<vmem>>, vector<8x128xf32>
    tpu.vector_store %arg4[%c0_5, %c0_6], %4 {strides = array<i32>} : memref<8x128xf32, #tpu.memory_space<vmem>>, vector<8x128xf32>,
    return
  }
  func.func @transform_0(%arg0: i32) -> (i32, i32) {
    %c0_i32 = arith.constant 0 : i32
    %c0_i32_0 = arith.constant 0 : i32
    return %arg0, %c0_i32 : i32, i32
  }
  func.func @transform_1(%arg0: i32) -> (i32, i32) {
    %c0_i32 = arith.constant 0 : i32
    %c0_i32_0 = arith.constant 0 : i32
    %c0_i32_1 = arith.constant 0 : i32
    return %c0_i32, %c0_i32_0 : i32, i32
  }
  func.func @transform_2(%arg0: i32) -> (i32, i32) {
    %c0_i32 = arith.constant 0 : i32
    %c0_i32_0 = arith.constant 0 : i32
    return %arg0, %c0_i32 : i32, i32
  }
  func.func @transform_3(%arg0: i32) -> (i32, i32) {
    %c0_i32 = arith.constant 0 : i32
    %c0_i32_0 = arith.constant 0 : i32
    return %arg0, %c0_i32 : i32, i32
  }
}

</mosaic_0001>

<bundles_post_ra>
// kernel: tpu_custom_call.1
= control target key start
LH: loop header
LB: loop body
LE: loop exit
PB: predicated region body
PF: predicated region fallthrough
CT: control target
= control target key end

     0   :  { %8 = vsyncpa [#allocation3], 0  ;;  %s497_s0 = inlined_call_operand.hbm [shape: f32[8,16], index: 0, kind: input, shape index: {}]   ;;  %s498_s1 = inlined_call_operand.hbm [shape: f32[16,128], index: 1, kind: input, shape index: {}]   ;;  %s499_s2 = inlined_call_operand.vmem [shape: f32[3,128], index: 2, kind: input, shape index: {}]   ;;  %s500_s3 = inlined_call_operand.hbm [shape: f32[8,128], index: 3, kind: output, shape index: {}]  }
   0x1   :  { %9 = vsyncpa [#allocation6], 0 }
   0x2   :  { %10 = vsyncpa [#allocation4], 0  ;;  %s378_s12 = smov [#allocation2]   ;;  %s379_s14 = smov [#allocation5]  }
   0x3   :  { %s17_s13 = sshll.u32 %s378_s12, 4  ;;  %s26_s15 = sshll.u32 %s379_s14, 4  ;;  %s18_s13 = int_to_ptr.vmem [resolvable:$true] %s17_s13  ;;  %s412_s15 = int_to_ptr.vmem [resolvable:$true] %s26_s15 }
   0x4   :  { %s306_s18 = scalar_lea.hbm %s497_s0, 128 }
   0x5   :  { %p307_p0 = scmp.ne.s32.totalorder %s497_s0, %s306_s18  ;;  %p310_p1 = scmp.lt.u32.totalorder %s306_s18, %s497_s0 }
   0x7   :  { %p312_p2 = pnand %p310_p1, %p307_p0 }
   0x9   :  { %315 = shalt.err (!%p312_p2)
}
   0xa   :  { %s316_s23 = scalar_lea.vmem %s18_s13, 128  ;;  %p321_p4 = scmp.lt.s32.totalorder %s18_s13, %s18_s13 }
   0xb   :  { %p317_p3 = scmp.ne.s32.totalorder %s18_s13, %s316_s23  ;;  %p322_p5 = scmp.lt.s32.totalorder %s316_s23, %s316_s23 }
   0xd   :  { %p323_p6 = por %p322_p5, %p321_p4 }
   0xf   :  { %p324_p7 = pnand %p323_p6, %p317_p3 }
  0x11   :  { %327 = shalt.err (!%p324_p7)
}
  0x12   :  { %20 = dma.hbm_to_vmem [thread:$0]  %s497_s0, 128, %s18_s13, [#allocation3]  }
  0x13   :  { %s328_s28 = scalar_lea.hbm %s498_s1, 256 }
  0x14   :  { %p329_p8 = scmp.ne.s32.totalorder %s498_s1, %s328_s28  ;;  %p332_p9 = scmp.lt.u32.totalorder %s328_s28, %s498_s1 }
  0x16   :  { %p334_p10 = pnand %p332_p9, %p329_p8 }
  0x18   :  { %337 = shalt.err (!%p334_p10)
}
  0x19   :  { %s338_s6 = scalar_lea.vmem %s412_s15, 256  ;;  %p343_p12 = scmp.lt.s32.totalorder %s412_s15, %s412_s15 }
  0x1a   :  { %p339_p11 = scmp.ne.s32.totalorder %s412_s15, %s338_s6  ;;  %p344_p13 = scmp.lt.s32.totalorder %s338_s6, %s338_s6 }
  0x1c   :  { %p345_p0 = por %p344_p13, %p343_p12 }
  0x1e   :  { %p346_p1 = pnand %p345_p0, %p339_p11 }
  0x20   :  { %349 = shalt.err (!%p346_p1)
}
  0x21   :  { %s380_s0 = smov 128   ;;  %s381_s7 = smov 8  }
  0x22   :  { %32 = dma.hbm_to_vmem [thread:$0]  %s498_s1, 256, %s412_s15, [#allocation6], %s380_s0, %s380_s0, %s381_s7  }
  0x23   :  { %372 = dma.done.wait [#allocation3], 128  }
  0x24   :  { %373 = vsyncadd [#allocation3], 4294967168 }
  0x25   :  { %374 = dma.done.wait [#allocation6], 256  }
  0x26   :  { %375 = vsyncadd [#allocation6], 4294967040  ;;  %v382_v0 = vmov 0.0|0.0   ;;  %vm383_vm0 = vmmov 0   ;;  %v384_v1 = vmov 0.0   ;;  %v42_v2 = vld [vmem:[#allocation5] sm:$0xff]  ;;  %v48_v6 = vlaneseq }
  0x27   :  { %281 = vmatprep.subr.bf16.mxu0 %v382_v0  ;;  %278 = vmatprep.mubr.msk.f32.mxu0 %vm383_vm0, %v384_v1  ;;  %v43_v3 = vld [vmem:[#allocation5 + $0x8] sm:$0xff]  ;;  %v41_v5 = vld [vmem:[#allocation2] sm:$0xff]  ;;  %vm167_vm1 = vcmask 130048   ;;  %v385_v20 = vmov 2102212464   ;;  %s391_s15 = smov [#allocation7]  }
  0x28   :  { %v282_v4 = vpack.c.bf16 %v43_v3, %v42_v2  ;;  %v49_v7 = vshrl.u32 %v48_v6, 7  ;;  %v263_v9 = vld [vmem:[%s499_s2] ss:$0 sm:$0xff]  ;;  %v264_v11 = vld [vmem:[%s499_s2 + $0x1] ss:$0 sm:$0xff]  ;;  %s253_s16 = sshll.u32 %s391_s15, 4  ;;  %s254_s16 = int_to_ptr.vmem [resolvable:$true] %s253_s16 }
  0x29   :  { %v386_v22 = vmov 920167782   ;;  %v387_v27 = vmov 1326507024   ;;  %v388_v29 = vmov 683565275   ;;  %p355_p3 = scmp.lt.s32.totalorder %s254_s16, %s254_s16 }
  0x2a   :  { %283 = vmatpush3.bf16.msra.mxu0 %v282_v4  ;;  %v52_v8 = vcvt.s32.f32 %v49_v7  ;;  %v389_v31 = vmov 2475754826   ;;  %v390_v34 = vmov 2131351028   ;;  %s350_s17 = scalar_lea.vmem %s254_s16, 128 }
  0x2b   :  { %p351_p2 = scmp.ne.s32.totalorder %s254_s16, %s350_s17  ;;  %p356_p4 = scmp.lt.s32.totalorder %s350_s17, %s350_s17 }
  0x2c   :  { %v57_v10 = vmul.f32 %v263_v9, %v52_v8 }
  0x2d   :  { %279 = vmatmul.mubr.msk.f32.vlgmr.msra.gmra.mrb[0].mxu0 %vm167_vm1, %v41_v5  ;;  %p357_p5 = por %p356_p4, %p355_p3 }
  0x2e   :  { %v449_v12 = vadd.f32 %v264_v11, %v57_v10 }
  0x2f   :  { %p358_p6 = pnand %p357_p5, %p351_p2 }
  0x30   :  { %v66_v13 = vand.u32 2139095040, %v449_v12  ;;  %v63_v24 = vand.u32 2147483647, %v449_v12  ;;  %vm65_vm9 = vcmp.lt.s32.totalorder %v449_v12, 0  ;;  %vm155_vm14 = vweird.f32 %v449_v12 }
  0x32   :  { %v67_v14 = vshrl.u32 %v66_v13, 23  ;;  %v70_v39 = vand.u32 8388607, %v63_v24  ;;  %vm64_vm10 = vcmp.le.f32.partialorder %v63_v24, 0.7853982 }
  0x34   :  { %v265_v15 = vadd.s32 4294967169, %v67_v14  ;;  %v71_v45 = vor.u32 8388608, %v70_v39 }
  0x36   :  { %v73_v16 = vadd.s32 1, %v265_v15  ;;  %v111_v51 = vshll.u32 %v71_v45, 8 }
  0x38   :  { %vm74_vm2 = vcmp.gt.s32.totalorder %v73_v16, 0 }
  0x39   :  { %v75_v17 = vsel %vm74_vm2, %v73_v16, 0 }
  0x3a   :  { %v77_v18 = vand.u32 31, %v75_v17  ;;  %v76_v25 = vshrl.u32 %v75_v17, 5 }
  0x3c   :  { %v78_v19 = vsub.s32 32, %v77_v18  ;;  %v89_v21 = vshll.u32 %v385_v20, %v77_v18  ;;  %v92_v26 = vshll.u32 %v386_v22, %v77_v18  ;;  %v80_v30 = vshll.u32 %v388_v29, %v77_v18 }
  0x3d   :  { %v83_v32 = vshll.u32 %v389_v31, %v77_v18  ;;  %v86_v36 = vshll.u32 %v390_v34, %v77_v18  ;;  %vm98_vm3 = vcmp.lt.s32.totalorder %v76_v25, 4  ;;  %vm95_vm4 = vcmp.lt.s32.totalorder %v76_v25, 1 }
  0x3e   :  { %v90_v23 = vshrl.u32 %v386_v22, %v78_v19  ;;  %v93_v28 = vshrl.u32 %v387_v27, %v78_v19  ;;  %v81_v33 = vshrl.u32 %v389_v31, %v78_v19  ;;  %v84_v35 = vshrl.u32 %v390_v34, %v78_v19 }
  0x3f   :  { %v87_v37 = vshrl.u32 %v385_v20, %v78_v19  ;;  %vm97_vm5 = vcmp.lt.s32.totalorder %v76_v25, 3  ;;  %vm96_vm6 = vcmp.lt.s32.totalorder %v76_v25, 2  ;;  %v79_v56 = vshrl.u32 %v388_v29, %v78_v19 }
  0x40   :  { %v91_v38 = vor.u32 %v90_v23, %v89_v21  ;;  %v94_v40 = vor.u32 %v93_v28, %v92_v26  ;;  %v82_v41 = vor.u32 %v81_v33, %v80_v30  ;;  %v85_v42 = vor.u32 %v84_v35, %v83_v32 }
  0x41   :  { %v88_v43 = vor.u32 %v87_v37, %v86_v36 }
  0x42   :  { %v104_v44 = vsel %vm98_vm3, %v91_v38, 920167782  ;;  %v108_v46 = vsel %vm98_vm3, %v94_v40, 1326507024  ;;  %v103_v47 = vsel %vm95_vm4, %v82_v41, %v85_v42  ;;  %v99_v60 = vsel %vm95_vm4, %v79_v56, %v82_v41  ;;  %v270_v41 = vld [vmem:[%s499_s2 + $0x2] ss:$0 sm:$0xff] }
  0x43   :  { %v105_v48 = vsel %vm97_vm5, %v88_v43, %v104_v44  ;;  %v107_v49 = vsel %vm95_vm4, %v85_v42, %v88_v43  ;;  %v109_v50 = vsel %vm97_vm5, %v91_v38, %v108_v46  ;;  %v100_v59 = vsel %vm98_vm3, %v88_v43, 2102212464 }
  0x44   :  { %v106_v52 = vsel %vm96_vm6, %v103_v47, %v105_v48  ;;  %v110_v53 = vsel %vm96_vm6, %v107_v49, %v109_v50  ;;  %v101_v61 = vsel %vm97_vm5, %v85_v42, %v100_v59 }
  0x45   :  { %v463_v54 = vmul.u32.u64.low %v111_v51, %v106_v52  ;;  %v464_v55 = vmul.u32.u64.high %v111_v51, %v106_v52, %v463_v54  ;;  %v466_v57 = vmul.u32.u64.low %v111_v51, %v110_v53  ;;  %v467_v58 = vmul.u32.u64.high %v111_v51, %v110_v53, %v466_v57 }
  0x46   :  { %v102_v62 = vsel %vm96_vm6, %v99_v60, %v101_v61 }
  0x47   :  { %v121_v63 = vadd.s32 1, %v464_v55  ;;  %vm120_vm7 = vc.u32 %v467_v58, %v463_v54  ;;  %v118_v0 = vmul.u32 %v111_v51, %v102_v62  ;;  %v119_v14 = vadd.s32 %v463_v54, %v467_v58 }
  0x49   :  { %v122_v1 = vsel %vm120_vm7, %v121_v63, %v464_v55 }
  0x4a   :  { %v123_v2 = vadd.s32 %v122_v1, %v118_v0 }
  0x4c   :  { %v124_v3 = vadd.s32 536870912, %v123_v2 }
  0x4e   :  { %v125_v4 = vshrl.u32 %v124_v3, 30 }
  0x50   :  { %v126_v5 = vshll.u32 %v125_v4, 30  ;;  %v149_v28 = vsub.s32 4, %v125_v4 }
  0x52   :  { %v127_v6 = vsub.s32 %v123_v2, %v126_v5  ;;  %v150_v30 = vsel %vm65_vm9, %v149_v28, %v125_v4 }
  0x53   :  { %v152_v31 = vsel %vm64_vm10, 0, %v150_v30 }
  0x54   :  { %v129_v7 = vsub.s32 0, %v127_v6  ;;  %v156_v32 = vadd.s32 3, %v152_v31 }
  0x56   :  { %v266_v8 = vmin.u32 %v129_v7, %v127_v6  ;;  %v157_v35 = vand.u32 3, %v156_v32 }
  0x58   :  { %v131_v9 = vclz %v266_v8  ;;  %vm159_vm11 = vcmp.eq.s32.totalorder %v157_v35, 0  ;;  %vm162_vm12 = vcmp.eq.s32.totalorder %v157_v35, 2  ;;  %vm158_vm13 = vcmp.lt.s32.totalorder %v157_v35, 2 }
  0x5a   :  { %v267_v10 = vadd.s32 4294967294, %v131_v9 }
  0x5c   :  { %vm268_vm8 = vcmp.lt.s32.totalorder %v267_v10, 0 }
  0x5d   :  { %v134_v11 = vsel %vm268_vm8, 0, %v267_v10 }
  0x5e   :  { %v139_v13 = vsub.s32 4294967266, %v134_v11  ;;  %v135_v15 = vsub.s32 32, %v134_v11  ;;  %v136_v17 = vshll.u32 %v127_v6, %v134_v11 }
  0x60   :  { %v140_v16 = vadd.s32 127, %v139_v13  ;;  %v137_v18 = vshrl.u32 %v119_v14, %v135_v15 }
  0x62   :  { %v141_v19 = vshll.u32 %v140_v16, 23  ;;  %v138_v20 = vor.u32 %v137_v18, %v136_v17 }
  0x64   :  { %v142_v21 = vor.u32 4788187, %v141_v19  ;;  %v145_v23 = vcvt.s32.f32 %v138_v20 }
  0x66   :  { %v143_v22 = vand.u32 2147483647, %v142_v21 }
  0x68   :  { %v146_v25 = vmul.f32 %v145_v23, %v143_v22 }
  0x6a   :  { %v147_v26 = vxor.u32 2147483648, %v146_v25 }
  0x6c   :  { %v148_v27 = vsel %vm65_vm9, %v147_v26, %v146_v25 }
  0x6d   :  { %v151_v29 = vsel %vm64_vm10, %v449_v12, %v148_v27 }
  0x6e   :  { %302 = vcosq.f32 %v151_v29 }
  0x6f   :  { %304 = vsinq.f32 %v151_v29 }
  0x78   :  { %v303_v33 = vpop.eup %302 }
  0x79   :  { %v305_v34 = vpop.eup %304  ;;  %v163_v37 = vxor.u32 2147483648, %v303_v33 }
  0x7a   :  { %v160_v36 = vxor.u32 2147483648, %v305_v34 }
  0x7b   :  { %v164_v39 = vsel %vm162_vm12, %v163_v37, %v305_v34 }
  0x7c   :  { %v161_v38 = vsel %vm159_vm11, %v303_v33, %v160_v36 }
  0x7d   :  { %v165_v24 = vsel %vm158_vm13, %v161_v38, %v164_v39 }
  0x7e   :  { %v166_v40 = vsel %vm155_vm14, nan, %v165_v24 }
 0x100   :  { %v237_v42 = vpop.f32.mrb[0].mxu0 }
 0x101   :  { %v238_v43 = vadd.f32 %v237_v42, %v166_v40  ;;  %v280_v44 = vpop.f32.mrb[1].mxu0 }
 0x103   :  { %v245_v45 = vadd.f32 %v270_v41, %v238_v43 }
 0x105   :  { %246 = vst [vmem:[#allocation7] sm:$0xff] %v245_v45 }
 0x106   :  { %361 = shalt.err (!%p358_p6)
}
 0x107   :  { %s362_s20 = scalar_lea.hbm %s500_s3, 128 }
 0x108   :  { %p363_p7 = scmp.ne.s32.totalorder %s500_s3, %s362_s20  ;;  %p366_p8 = scmp.lt.u32.totalorder %s362_s20, %s500_s3 }
 0x10a   :  { %p368_p9 = pnand %p366_p8, %p363_p7 }
 0x10c   :  { %371 = shalt.err (!%p368_p9)
}
 0x10d   :  { %256 = dma.vmem_to_hbm [thread:$0]  %s254_s16, 128, %s500_s3, [#allocation4]  }
 0x10e   :  { %376 = dma.done.wait [#allocation4], 128  }
 0x10f   :  { %377 = vsyncadd [#allocation4], 4294967168 }
 0x110   :  { %260 = vsyncpa [#allocation3], 1 }
 0x111   :  { %261 = vsyncpa [#allocation6], 1 }
 0x112   :  { %262 = vsyncpa [#allocation4], 1 }

// kernel: tpu_custom_call.1
= control target key start
LH: loop header
LB: loop body
LE: loop exit
PB: predicated region body
PF: predicated region fallthrough
CT: control target
= control target key end

     0   :  { %8 = vsyncpa [#allocation3], 0  ;;  %s344_s0 = inlined_call_operand.hbm [shape: f32[8,16], index: 0, kind: input, shape index: {}]   ;;  %s345_s1 = inlined_call_operand.hbm [shape: f32[16,128], index: 1, kind: input, shape index: {}]   ;;  %s346_s2 = inlined_call_operand.hbm [shape: f32[32,128], index: 2, kind: input, shape index: {}]   ;;  %s347_s3 = inlined_call_operand.hbm [shape: f32[8,128], index: 3, kind: output, shape index: {}]  }
   0x1   :  { %9 = vsyncpa [#allocation6], 0 }
   0x2   :  { %10 = vsyncpa [#allocation4], 0  ;;  %s264_s12 = smov [#allocation5]   ;;  %s170_s16 = scalar_lea.hbm %s345_s1, 256 }
   0x3   :  { %s26_s13 = sshll.u32 %s264_s12, 4  ;;  %p171_p0 = scmp.ne.s32.totalorder %s345_s1, %s170_s16  ;;  %s27_s13 = int_to_ptr.vmem [resolvable:$true] %s26_s13 }
   0x4   :  { %p174_p1 = scmp.lt.u32.totalorder %s170_s16, %s345_s1 }
   0x6   :  { %p176_p2 = pnand %p174_p1, %p171_p0 }
   0x8   :  { %179 = shalt.err (!%p176_p2)
}
   0x9   :  { %s180_s21 = scalar_lea.vmem %s27_s13, 256  ;;  %p185_p4 = scmp.lt.s32.totalorder %s27_s13, %s27_s13 }
   0xa   :  { %p181_p3 = scmp.ne.s32.totalorder %s27_s13, %s180_s21  ;;  %p186_p5 = scmp.lt.s32.totalorder %s180_s21, %s180_s21 }
   0xc   :  { %p187_p6 = por %p186_p5, %p185_p4 }
   0xe   :  { %p188_p7 = pnand %p187_p6, %p181_p3 }
  0x10   :  { %191 = shalt.err (!%p188_p7)
}
  0x11   :  { %s265_s22 = smov 128   ;;  %s266_s23 = smov 8  }
  0x12   :  { %32 = dma.hbm_to_vmem [thread:$0]  %s345_s1, 256, %s27_s13, [#allocation6], %s265_s22, %s265_s22, %s266_s23  }
  0x13   :  { %s267_s26 = smov [#allocation2]   ;;  %s268_s28 = smov [#allocation7]  }
  0x14   :  { %s17_s27 = sshll.u32 %s267_s26, 4  ;;  %s39_s29 = sshll.u32 %s268_s28, 4  ;;  %s18_s27 = int_to_ptr.vmem [resolvable:$true] %s17_s27  ;;  %s40_s29 = int_to_ptr.vmem [resolvable:$true] %s39_s29 }
  0x15   :  { %s192_s5 = scalar_lea.hbm %s344_s0, 128 }
  0x16   :  { %p193_p8 = scmp.ne.s32.totalorder %s344_s0, %s192_s5  ;;  %p196_p9 = scmp.lt.u32.totalorder %s192_s5, %s344_s0 }
  0x18   :  { %p198_p10 = pnand %p196_p9, %p193_p8 }
  0x1a   :  { %201 = shalt.err (!%p198_p10)
}
  0x1b   :  { %s202_s1 = scalar_lea.vmem %s18_s27, 128  ;;  %p207_p12 = scmp.lt.s32.totalorder %s18_s27, %s18_s27 }
  0x1c   :  { %p203_p11 = scmp.ne.s32.totalorder %s18_s27, %s202_s1  ;;  %p208_p13 = scmp.lt.s32.totalorder %s202_s1, %s202_s1 }
  0x1e   :  { %p209_p0 = por %p208_p13, %p207_p12 }
  0x20   :  { %p210_p1 = pnand %p209_p0, %p203_p11 }
  0x22   :  { %213 = shalt.err (!%p210_p1)
}
  0x23   :  { %20 = dma.hbm_to_vmem [thread:$0]  %s344_s0, 128, %s18_s27, [#allocation3]  }
  0x24   :  { %s214_s14 = scalar_lea.hbm %s346_s2, 128  ;;  %s216_s19 = scalar_lea.hbm %s346_s2, 512 }
  0x25   :  { %p215_p2 = scmp.ne.s32.totalorder %s346_s2, %s214_s14  ;;  %p217_p3 = scmp.lt.u32.totalorder %s216_s19, %s214_s14 }
  0x26   :  { %p218_p4 = scmp.lt.u32.totalorder %s214_s14, %s346_s2 }
  0x28   :  { %p219_p5 = por %p218_p4, %p217_p3 }
  0x2a   :  { %p220_p6 = pnand %p219_p5, %p215_p2 }
  0x2c   :  { %223 = shalt.err (!%p220_p6)
}
  0x2d   :  { %s224_s0 = scalar_lea.vmem %s40_s29, 128  ;;  %p229_p8 = scmp.lt.s32.totalorder %s40_s29, %s40_s29 }
  0x2e   :  { %p225_p7 = scmp.ne.s32.totalorder %s40_s29, %s224_s0  ;;  %p230_p9 = scmp.lt.s32.totalorder %s224_s0, %s224_s0 }
  0x30   :  { %p231_p10 = por %p230_p9, %p229_p8 }
  0x32   :  { %p232_p11 = pnand %p231_p10, %p225_p7 }
  0x34   :  { %235 = shalt.err (!%p232_p11)
}
  0x35   :  { %42 = dma.hbm_to_vmem [thread:$0]  %s346_s2, 128, %s40_s29, [#allocation6]  }
  0x36   :  { %258 = dma.done.wait [#allocation3], 128  }
  0x37   :  { %259 = vsyncadd [#allocation3], 4294967168 }
  0x38   :  { %260 = dma.done.wait [#allocation6], 384  }
  0x39   :  { %261 = vsyncadd [#allocation6], 4294966912  ;;  %v269_v0 = vmov 0.0|0.0   ;;  %vm270_vm0 = vmmov 0   ;;  %v271_v1 = vmov 0.0   ;;  %v53_v2 = vld [vmem:[#allocation5] sm:$0xff] }
  0x3a   :  { %158 = vmatprep.subr.bf16.mxu0 %v269_v0  ;;  %155 = vmatprep.mubr.msk.f32.mxu0 %vm270_vm0, %v271_v1  ;;  %v54_v3 = vld [vmem:[#allocation5 + $0x8] sm:$0xff]  ;;  %v52_v5 = vld [vmem:[#allocation2] sm:$0xff]  ;;  %vm56_vm1 = vcmask 130048   ;;  %v55_v6 = vld [vmem:[#allocation7] sm:$0xff]  ;;  %s272_s24 = smov [#allocation8]  }
  0x3b   :  { %v159_v4 = vpack.c.bf16 %v54_v3, %v53_v2  ;;  %s137_s25 = sshll.u32 %s272_s24, 4  ;;  %s138_s25 = int_to_ptr.vmem [resolvable:$true] %s137_s25 }
  0x3c   :  { %s236_s2 = scalar_lea.vmem %s138_s25, 128  ;;  %p241_p13 = scmp.lt.s32.totalorder %s138_s25, %s138_s25 }
  0x3d   :  { %160 = vmatpush3.bf16.msra.mxu0 %v159_v4  ;;  %p237_p12 = scmp.ne.s32.totalorder %s138_s25, %s236_s2  ;;  %p242_p0 = scmp.lt.s32.totalorder %s236_s2, %s236_s2 }
  0x3f   :  { %p243_p1 = por %p242_p0, %p241_p13 }
  0x40   :  { %156 = vmatmul.mubr.msk.f32.vlgmr.msra.gmra.mrb[0].mxu0 %vm56_vm1, %v52_v5 }
  0x41   :  { %p244_p2 = pnand %p243_p1, %p237_p12 }
 0x113   :  { %v126_v7 = vpop.f32.mrb[0].mxu0 }
 0x114   :  { %v127_v8 = vadd.f32 %v126_v7, %v55_v6  ;;  %v157_v9 = vpop.f32.mrb[1].mxu0 }
 0x116   :  { %130 = vst [vmem:[#allocation8] sm:$0xff] %v127_v8 }
 0x117   :  { %247 = shalt.err (!%p244_p2)
}
 0x118   :  { %s248_s28 = scalar_lea.hbm %s347_s3, 128 }
 0x119   :  { %p249_p3 = scmp.ne.s32.totalorder %s347_s3, %s248_s28  ;;  %p252_p4 = scmp.lt.u32.totalorder %s248_s28, %s347_s3 }
 0x11b   :  { %p254_p5 = pnand %p252_p4, %p249_p3 }
 0x11d   :  { %257 = shalt.err (!%p254_p5)
}
 0x11e   :  { %140 = dma.vmem_to_hbm [thread:$0]  %s138_s25, 128, %s347_s3, [#allocation4]  }
 0x11f   :  { %262 = dma.done.wait [#allocation4], 128  }
 0x120   :  { %263 = vsyncadd [#allocation4], 4294967168 }
 0x121   :  { %144 = vsyncpa [#allocation3], 1 }
 0x122   :  { %145 = vsyncpa [#allocation6], 1 }
 0x123   :  { %146 = vsyncpa [#allocation4], 1 }

</bundles_post_ra>
